<compile_context>
chip_gen: v5e
topology: v5e:2x2
jax: 0.10.0
libtpu: 0.0.40
codegen_flags: <defaults>
</compile_context>

<pallas_src>
import functools

import jax
import jax.numpy as jnp
import numpy as np
from jax import lax
from jax.experimental import pallas as pl
from jax.experimental.pallas import tpu as pltpu


def _interp_matrix(n_in: int, n_out: int) -> np.ndarray:
    """Bilinear interpolation matrix (n_out, n_in) with align_corners=True."""
    A = np.zeros((n_out, n_in), dtype=np.float32)
    if n_in == 1:
        A[:, 0] = 1.0
        return A
    for i in range(n_out):
        src = i * (n_in - 1) / (n_out - 1)
        i0 = int(np.floor(src))
        i1 = min(i0 + 1, n_in - 1)
        w = src - i0
        A[i, i0] += 1.0 - w
        A[i, i1] += w
    return A


def _interp_matrix_padded(n_in: int, n_out: int, pad_before: int,
                          n_total: int) -> np.ndarray:
    """Interp matrix with the zero-pad folded in: (n_total, n_in)."""
    A = np.zeros((n_total, n_in), dtype=np.float32)
    A[pad_before:pad_before + n_out, :] = _interp_matrix(n_in, n_out)
    return A


def _up_concat_kernel(x1_ref, x2_ref, ahp_ref, awpt_ref, o_ref, *,
                      c2, merge_ch_rows):
    # x1_ref:  (1, C1, H, W)    low-res decoder feature (one sample)
    # x2_ref:  (1, C2, Hp, Wp)  skip connection (one sample)
    # ahp_ref: (Hp, H)          row-interp matrix, pad folded in
    # awpt_ref:(W, Wp)          col-interp matrix (transposed), pad folded in
    # o_ref:   (1, C2+C1, Hp, Wp)  fused concat output

    # Skip-connection channels -> output channels [0, C2): full-tile copy.
    o_ref[0, :c2] = x2_ref[0].astype(o_ref.dtype)

    x = x1_ref[0].astype(jnp.float32)            # (C1, H, W)
    c1, h, w = x.shape
    ahp = ahp_ref[...]                           # (Hp, H)
    awpt = awpt_ref[...]                         # (W, Wp)
    hp = ahp.shape[0]
    wp = awpt.shape[1]

    # W-interp (left/right zero pad folded into awpt).
    if merge_ch_rows:
        # One big MXU matmul; (C1, H, W) -> (C1*H, W) is layout-preserving
        # when H % 8 == 0.
        xw = jnp.dot(x.reshape(c1 * h, w), awpt,
                     preferred_element_type=jnp.float32).reshape(c1, h, wp)
    else:
        xw = lax.dot_general(
            x, jnp.broadcast_to(awpt, (c1, w, wp)),
            dimension_numbers=(((2,), (1,)), ((0,), (0,))),
            preferred_element_type=jnp.float32)  # (C1, H, Wp)

    # H-interp (top/bottom zero pad folded into ahp): batched over channels.
    up = lax.dot_general(
        jnp.broadcast_to(ahp, (c1, hp, h)), xw,
        dimension_numbers=(((2,), (1,)), ((0,), (0,))),
        preferred_element_type=jnp.float32)      # (C1, Hp, Wp)

    # Upsampled + padded x1 -> output channels [C2, C2+C1): full-tile store.
    o_ref[0, c2:] = up.astype(o_ref.dtype)


def up_forward(x1, x2):
    """Pallas equivalent of Up.forward(x1, x2). NCHW in, NCHW out."""
    N, C1, H, W = x1.shape
    N2, C2, Hp, Wp = x2.shape
    assert N == N2
    H2, W2 = 2 * H, 2 * W
    diffY = Hp - H2
    diffX = Wp - W2
    # TODO(synk): negative diff (F.pad with negative pad == crop) not handled;
    # standard U-Net decoder usage has x2 spatially >= upsampled x1.
    assert diffY >= 0 and diffX >= 0
    pad_t = diffY // 2
    pad_l = diffX // 2

    out_dtype = jnp.result_type(x1.dtype, x2.dtype)

    # Pad-folded separable interpolation matrices.
    A_h_pad = jnp.asarray(_interp_matrix_padded(H, H2, pad_t, Hp))       # (Hp, H)
    A_w_padT = jnp.asarray(_interp_matrix_padded(W, W2, pad_l, Wp).T)    # (W, Wp)

    kern = functools.partial(_up_concat_kernel, c2=C2,
                             merge_ch_rows=(H % 8 == 0))

    flops = 2 * N * C1 * H * Wp * (W + Hp)
    bytes_accessed = int(
        x1.size * x1.dtype.itemsize + x2.size * x2.dtype.itemsize
        + A_h_pad.size * 4 + A_w_padT.size * 4
        + N * (C1 + C2) * Hp * Wp * jnp.dtype(out_dtype).itemsize)

    # TODO(synk): for very large per-sample blocks (huge C at high spatial
    # resolution) add a channel-tiling grid axis so double-buffered blocks stay
    # under v7x's 64 MiB VMEM; typical U-Net decoder levels fit comfortably.
    out = pl.pallas_call(
        kern,
        out_shape=jax.ShapeDtypeStruct((N, C2 + C1, Hp, Wp), out_dtype),
        grid=(N,),
        in_specs=[
            pl.BlockSpec((1, C1, H, W), lambda n: (n, 0, 0, 0)),
            pl.BlockSpec((1, C2, Hp, Wp), lambda n: (n, 0, 0, 0)),
            pl.BlockSpec((Hp, H), lambda n: (0, 0)),
            pl.BlockSpec((W, Wp), lambda n: (0, 0)),
        ],
        out_specs=pl.BlockSpec((1, C2 + C1, Hp, Wp), lambda n: (n, 0, 0, 0)),
        compiler_params=pltpu.CompilerParams(
            dimension_semantics=("parallel",)),
        cost_estimate=pl.CostEstimate(
            flops=flops, transcendentals=0, bytes_accessed=bytes_accessed),
    )(x1, x2, A_h_pad, A_w_padT)
    return out


def up_forward_ref(x1, x2):
    """Plain-JAX reference (same math) for validation."""
    N, C1, H, W = x1.shape
    _, _, Hp, Wp = x2.shape
    H2, W2 = 2 * H, 2 * W
    A_h = jnp.asarray(_interp_matrix(H, H2))
    A_w = jnp.asarray(_interp_matrix(W, W2))
    up = jnp.einsum('oh,nchw,vw->ncov', A_h, x1, A_w)
    diffY, diffX = Hp - H2, Wp - W2
    up = jnp.pad(up, ((0, 0), (0, 0),
                      (diffY // 2, diffY - diffY // 2),
                      (diffX // 2, diffX - diffX // 2)))
    return jnp.concatenate([x2, up], axis=1)


if __name__ == "__main__":
    key = jax.random.PRNGKey(0)
    k1, k2 = jax.random.split(key)
    # x1: low-res decoder feature; x2: skip connection (slightly larger spatial
    # so the F.pad path with diff=2 -> pad 1/1/1/1 is exercised).
    x1 = jax.random.normal(k1, (2, 4, 8, 8), dtype=jnp.float32)
    x2 = jax.random.normal(k2, (2, 6, 18, 18), dtype=jnp.float32)

    out = jax.block_until_ready(up_forward(x1, x2))

    ref = up_forward_ref(x1, x2)
    assert out.shape == (2, 10, 18, 18), out.shape
    np.testing.assert_allclose(np.asarray(out), np.asarray(ref),
                               rtol=1e-5, atol=1e-5)
    print("KERNEL_OK")
</pallas_src>

<mosaic_0001>
module attributes {stable_mosaic.version = 11 : i64} {
  func.func @_up_concat_kernel(%arg0: i32, %arg1: memref<1x4x8x8xf32, #tpu.memory_space<vmem>>, %arg2: memref<1x6x18x18xf32, #tpu.memory_space<vmem>>, %arg3: memref<18x8xf32, #tpu.memory_space<vmem>>, %arg4: memref<8x18xf32, #tpu.memory_space<vmem>>, %arg5: memref<1x10x18x18xf32, #tpu.memory_space<vmem>>) attributes {dimension_semantics = [#tpu.dimension_semantics<parallel>], iteration_bounds = array<i64: 2>, scalar_prefetch = 0 : i64, scratch_operands = 0 : i64, tpu.core_type = #tpu.core_type<tc>, window_params = [{transform_indices = @transform_0, window_bounds = array<i64: 1, 4, 8, 8>}, {transform_indices = @transform_1, window_bounds = array<i64: 1, 6, 18, 18>}, {pipeline_mode = #tpu.pipeline_mode<synchronous>, transform_indices = @transform_2, window_bounds = array<i64: 18, 8>}, {pipeline_mode = #tpu.pipeline_mode<synchronous>, transform_indices = @transform_3, window_bounds = array<i64: 8, 18>}, {transform_indices = @transform_4, window_bounds = array<i64: 1, 10, 18, 18>}]} {
    %c0 = arith.constant 0 : index
    %c0_0 = arith.constant 0 : index
    %c0_1 = arith.constant 0 : index
    %c0_2 = arith.constant 0 : index
    %0 = vector.load %arg2[%c0, %c0_0, %c0_1, %c0_2] : memref<1x6x18x18xf32, #tpu.memory_space<vmem>>, vector<1x6x18x18xf32>
    %1 = vector.shape_cast %0 : vector<1x6x18x18xf32> to vector<6x18x18xf32>
    %c0_3 = arith.constant 0 : index
    %c0_4 = arith.constant 0 : index
    %c0_5 = arith.constant 0 : index
    %c0_6 = arith.constant 0 : index
    %2 = vector.load %arg5[%c0_3, %c0_4, %c0_5, %c0_6] : memref<1x10x18x18xf32, #tpu.memory_space<vmem>>, vector<1x6x18x18xf32>
    %3 = vector.shape_cast %2 : vector<1x6x18x18xf32> to vector<6x18x18xf32>
    %4 = vector.shape_cast %1 : vector<6x18x18xf32> to vector<1x6x18x18xf32>
    tpu.vector_store %arg5[%c0_3, %c0_4, %c0_5, %c0_6], %4 {strides = array<i32>} : memref<1x10x18x18xf32, #tpu.memory_space<vmem>>, vector<1x6x18x18xf32>,
    %c0_7 = arith.constant 0 : index
    %c0_8 = arith.constant 0 : index
    %c0_9 = arith.constant 0 : index
    %c0_10 = arith.constant 0 : index
    %5 = vector.load %arg1[%c0_7, %c0_8, %c0_9, %c0_10] : memref<1x4x8x8xf32, #tpu.memory_space<vmem>>, vector<1x4x8x8xf32>
    %6 = vector.shape_cast %5 : vector<1x4x8x8xf32> to vector<4x8x8xf32>
    %c0_11 = arith.constant 0 : index
    %c0_12 = arith.constant 0 : index
    %7 = vector.load %arg3[%c0_11, %c0_12] : memref<18x8xf32, #tpu.memory_space<vmem>>, vector<18x8xf32>
    %c0_13 = arith.constant 0 : index
    %c0_14 = arith.constant 0 : index
    %8 = vector.load %arg4[%c0_13, %c0_14] : memref<8x18xf32, #tpu.memory_space<vmem>>, vector<8x18xf32>
    %9 = vector.shape_cast %6 : vector<4x8x8xf32> to vector<32x8xf32>
    %cst = arith.constant dense<0.000000e+00> : vector<32x18xf32>
    %10 = tpu.matmul %9, %8, %cst {dimension_numbers = #tpu.dot_dimension_numbers<[1], [0], [0], [1], [0, 0, 1, 1], [], []>} : vector<32x8xf32>, vector<8x18xf32>, vector<32x18xf32> -> vector<32x18xf32>
    %11 = vector.shape_cast %10 : vector<32x18xf32> to vector<4x8x18xf32>
    %12 = vector.shape_cast %7 : vector<18x8xf32> to vector<1x18x8xf32>
    %13 = vector.broadcast %12 : vector<1x18x8xf32> to vector<4x18x8xf32>
    %cst_15 = arith.constant dense<0.000000e+00> : vector<4x18x18xf32>
    %14 = tpu.matmul %13, %11, %cst_15 {dimension_numbers = #tpu.dot_dimension_numbers<[2], [1], [1], [2], [0, 0, 0, 1, 1, 2], [0], [0]>} : vector<4x18x8xf32>, vector<4x8x18xf32>, vector<4x18x18xf32> -> vector<4x18x18xf32>
    %c0_16 = arith.constant 0 : index
    %c6 = arith.constant 6 : index
    %c0_17 = arith.constant 0 : index
    %c0_18 = arith.constant 0 : index
    %15 = vector.load %arg5[%c0_16, %c6, %c0_17, %c0_18] : memref<1x10x18x18xf32, #tpu.memory_space<vmem>>, vector<1x4x18x18xf32>
    %16 = vector.shape_cast %15 : vector<1x4x18x18xf32> to vector<4x18x18xf32>
    %17 = vector.shape_cast %14 : vector<4x18x18xf32> to vector<1x4x18x18xf32>
    tpu.vector_store %arg5[%c0_16, %c6, %c0_17, %c0_18], %17 {strides = array<i32>} : memref<1x10x18x18xf32, #tpu.memory_space<vmem>>, vector<1x4x18x18xf32>,
    return
  }
  func.func @transform_0(%arg0: i32) -> (i32, i32, i32, i32) {
    %c0_i32 = arith.constant 0 : i32
    %c0_i32_0 = arith.constant 0 : i32
    %c0_i32_1 = arith.constant 0 : i32
    %c0_i32_2 = arith.constant 0 : i32
    return %arg0, %c0_i32, %c0_i32_0, %c0_i32_1 : i32, i32, i32, i32
  }
  func.func @transform_1(%arg0: i32) -> (i32, i32, i32, i32) {
    %c0_i32 = arith.constant 0 : i32
    %c0_i32_0 = arith.constant 0 : i32
    %c0_i32_1 = arith.constant 0 : i32
    %c0_i32_2 = arith.constant 0 : i32
    return %arg0, %c0_i32, %c0_i32_0, %c0_i32_1 : i32, i32, i32, i32
  }
  func.func @transform_2(%arg0: i32) -> (i32, i32) {
    %c0_i32 = arith.constant 0 : i32
    %c0_i32_0 = arith.constant 0 : i32
    %c0_i32_1 = arith.constant 0 : i32
    return %c0_i32, %c0_i32_0 : i32, i32
  }
  func.func @transform_3(%arg0: i32) -> (i32, i32) {
    %c0_i32 = arith.constant 0 : i32
    %c0_i32_0 = arith.constant 0 : i32
    %c0_i32_1 = arith.constant 0 : i32
    return %c0_i32, %c0_i32_0 : i32, i32
  }
  func.func @transform_4(%arg0: i32) -> (i32, i32, i32, i32) {
    %c0_i32 = arith.constant 0 : i32
    %c0_i32_0 = arith.constant 0 : i32
    %c0_i32_1 = arith.constant 0 : i32
    %c0_i32_2 = arith.constant 0 : i32
    return %arg0, %c0_i32, %c0_i32_0, %c0_i32_1 : i32, i32, i32, i32
  }
}

</mosaic_0001>

<bundles_post_ra>
// kernel: tpu_custom_call.1
= control target key start
LH: loop header
LB: loop body
LE: loop exit
PB: predicated region body
PF: predicated region fallthrough
CT: control target
= control target key end

     0   :  { %s584_s15 = smov 0   ;;  %s720_s0 = inlined_call_operand.vmem [shape: f32[2,4,8,8], index: 0, kind: input, shape index: {}]   ;;  %s721_s1 = inlined_call_operand.vmem [shape: f32[2,6,18,18], index: 1, kind: input, shape index: {}]   ;;  %s722_s2 = inlined_call_operand.vmem [shape: f32[18,8], index: 2, kind: input, shape index: {}]   ;;  %s723_s3 = inlined_call_operand.vmem [shape: f32[8,18], index: 3, kind: input, shape index: {}]   ;;  %s724_s4 = inlined_call_operand.vmem [shape: f32[2,10,18,18], index: 4, kind: output, shape index: {}]  }
   0x1 LB: > { %s499_s16 = sadd.s32 4294967295, %s557_s15   ;;  %p503_p0 = scmp.ge.s32.totalorder %s557_s15, 1  ;;  %s557_s15 = sphi %s584_s15, %s14_s15  }
   0x2   : > { %p172_p1 = scmp.lt.s32.totalorder %s557_s15, 3 }
   0x4   : > { %p173_p2 = pnand %p503_p0, %p172_p1 }
   0x5   : > { %p203_p3 = scmp.lt.s32.totalorder (!%p173_p2), %s499_s16, 1 }
   0x6   : > { %176 = sbr.rel (%p173_p2) target bundleno = 309 (0x135), region = 36 }
   0xb   : > { %v263_v0 = vld [vmem:[%s723_s3] sm:$0xff]  ;;  %s726_s16 = smov (!%p203_p3, %s499_s16), 1  ;;  %vm264_vm0 = vcmask 64512   ;;  %vm236_vm1 = vcmask 146432   ;;  %v261_v17 = vld [vmem:[%s722_s2 + $0x8] sm:$0xff]  ;;  %vm239_vm2 = vcmask 140288  }
   0xc   : > { %292 = vmatpush.msra.mxu0 %v263_v0  ;;  %s538_s19 = sshll.u32 %s726_s16, 5  ;;  %s541_s20 = smul.u32 144, %s726_s16  ;;  %v262_v19 = vld [vmem:[%s722_s2 + $0x10] sm:$0x3]  ;;  %v260_v20 = vld [vmem:[%s722_s2] sm:$0xff] }
   0xd   : > { %s598_s23 = scalar_lea.vmem %s720_s0, %s538_s19  ;;  %s542_s24 = smul.u32 240, %s726_s16 }
   0xe   : > { %s603_s27 = scalar_lea.vmem %s721_s1, %s541_s20  ;;  %v256_v1 = vld [vmem:[%s598_s23] sm:$0xff]  ;;  %v257_v10 = vld [vmem:[%s598_s23 + $0x8] sm:$0xff]  ;;  %v258_v15 = vld [vmem:[%s598_s23 + $0x10] sm:$0xff] }
   0xf   : > { %s609_s30 = scalar_lea.vmem %s724_s4, %s542_s24  ;;  %v218_v2 = vld [vmem:[%s603_s27] sm:$0xff]  ;;  %v219_v3 = vld [vmem:[%s603_s27 + $0x8] sm:$0xff]  ;;  %v221_v4 = vld [vmem:[%s603_s27 + $0x18] sm:$0xff]  ;;  %508 = vmatmul.msk.f32.vlgmr.msra.gmra.mxu0 %vm264_vm0, %v256_v1 }
  0x10   : > { %v222_v5 = vld [vmem:[%s603_s27 + $0x20] sm:$0xff]  ;;  %237 = vst.msk [vmem:[%s609_s30] sm:$0xff] %vm236_vm1, %v218_v2  ;;  %v224_v6 = vld [vmem:[%s603_s27 + $0x30] sm:$0xff]  ;;  %v225_v7 = vld [vmem:[%s603_s27 + $0x38] sm:$0xff] }
  0x11   : > { %238 = vst.msk [vmem:[%s609_s30 + $0x8] sm:$0xff] %vm236_vm1, %v219_v3  ;;  %v227_v8 = vld [vmem:[%s603_s27 + $0x48] sm:$0xff]  ;;  %v228_v9 = vld [vmem:[%s603_s27 + $0x50] sm:$0xff]  ;;  %v230_v11 = vld [vmem:[%s603_s27 + $0x60] sm:$0xff] }
  0x12   : > { %241 = vst.msk [vmem:[%s609_s30 + $0x18] sm:$0xff] %vm236_vm1, %v221_v4  ;;  %v231_v12 = vld [vmem:[%s603_s27 + $0x68] sm:$0xff]  ;;  %v233_v13 = vld [vmem:[%s603_s27 + $0x78] sm:$0xff]  ;;  %v234_v14 = vld [vmem:[%s603_s27 + $0x80] sm:$0xff] }
  0x13   : > { %242 = vst.msk [vmem:[%s609_s30 + $0x20] sm:$0xff] %vm236_vm1, %v222_v5  ;;  %v259_v16 = vld [vmem:[%s598_s23 + $0x18] sm:$0xff]  ;;  %v220_v24 = vld [vmem:[%s603_s27 + $0x10] sm:$0x3]  ;;  %v223_v25 = vld [vmem:[%s603_s27 + $0x28] sm:$0x3] }
  0x14   : > { %244 = vst.msk [vmem:[%s609_s30 + $0x30] sm:$0xff] %vm236_vm1, %v224_v6  ;;  %v226_v26 = vld [vmem:[%s603_s27 + $0x40] sm:$0x3]  ;;  %v229_v27 = vld [vmem:[%s603_s27 + $0x58] sm:$0x3] }
  0x15   : > { %245 = vst.msk [vmem:[%s609_s30 + $0x38] sm:$0xff] %vm236_vm1, %v225_v7  ;;  %v232_v28 = vld [vmem:[%s603_s27 + $0x70] sm:$0x3]  ;;  %v235_v29 = vld [vmem:[%s603_s27 + $0x88] sm:$0x3] }
  0x16   : > { %247 = vst.msk [vmem:[%s609_s30 + $0x48] sm:$0xff] %vm236_vm1, %v227_v8 }
  0x17   : > { %248 = vst.msk [vmem:[%s609_s30 + $0x50] sm:$0xff] %vm236_vm1, %v228_v9  ;;  %509 = vmatmul.msk.f32.gmra.mxu0 %vm264_vm0, %v257_v10 }
  0x18   : > { %250 = vst.msk [vmem:[%s609_s30 + $0x60] sm:$0xff] %vm236_vm1, %v230_v11 }
  0x19   : > { %251 = vst.msk [vmem:[%s609_s30 + $0x68] sm:$0xff] %vm236_vm1, %v231_v12 }
  0x1a   : > { %253 = vst.msk [vmem:[%s609_s30 + $0x78] sm:$0xff] %vm236_vm1, %v233_v13 }
  0x1b   : > { %254 = vst.msk [vmem:[%s609_s30 + $0x80] sm:$0xff] %vm236_vm1, %v234_v14 }
  0x1c   : > { %240 = vst.msk [vmem:[%s609_s30 + $0x10] sm:$0x3] %vm239_vm2, %v220_v24 }
  0x1d   : > { %243 = vst.msk [vmem:[%s609_s30 + $0x28] sm:$0x3] %vm239_vm2, %v223_v25 }
  0x1e   : > { %246 = vst.msk [vmem:[%s609_s30 + $0x40] sm:$0x3] %vm239_vm2, %v226_v26 }
  0x1f   : > { %510 = vmatmul.msk.f32.gmra.mxu0 %vm264_vm0, %v258_v15  ;;  %249 = vst.msk [vmem:[%s609_s30 + $0x58] sm:$0x3] %vm239_vm2, %v229_v27 }
  0x20   : > { %252 = vst.msk [vmem:[%s609_s30 + $0x70] sm:$0x3] %vm239_vm2, %v232_v28 }
  0x21   : > { %255 = vst.msk [vmem:[%s609_s30 + $0x88] sm:$0x3] %vm239_vm2, %v235_v29 }
  0x27   : > { %511 = vmatmul.msk.f32.gmra.mxu0 %vm264_vm0, %v259_v16 }
  0x8c   : > { %v294_v18 = vpop.f32.mrf.mxu0 }
  0x8d   : > { %330 = vmatpush.msra.mxu1 %v294_v18  ;;  %539 = vmatpush.msra.mxu2 %v294_v18 }
  0x8e   : > { %540 = vmatpush.msra.mxu3 %v294_v18  ;;  %513 = vmatmul.msk.f32.vlgmr.msra.gmra.mxu2 %vm264_vm0, %v261_v17 }
  0x8f   : > { %514 = vmatmul.msk.f32.vlgmr.msra.gmra.mxu3 %vm264_vm0, %v262_v19  ;;  %512 = vmatmul.msk.f32.vlgmr.msra.gmra.mxu1 %vm264_vm0, %v260_v20 }
  0x94   : > { %v297_v21 = vpop.f32.mrf.mxu0 }
  0x95   : > { %356 = vmatpush.msrb.mxu2 %v297_v21 }
  0x96   : > { %515 = vmatmul.msk.f32.vlgmr.msrb.gmra.mxu2 %vm264_vm0, %v260_v20 }
  0x9c   : > { %v300_v22 = vpop.f32.mrf.mxu0 }
  0x9d   : > { %382 = vmatpush.msrb.mxu3 %v300_v22 }
  0x9e   : > { %518 = vmatmul.msk.f32.vlgmr.msrb.gmra.mxu3 %vm264_vm0, %v260_v20  ;;  %516 = vmatmul.msk.f32.gmra.mxu2 %vm264_vm0, %v261_v17 }
  0xa4   : > { %v303_v23 = vpop.f32.mrf.mxu0 }
  0xa5   : > { %408 = vmatpush.msrb.mxu1 %v303_v23 }
  0xa6   : > { %521 = vmatmul.msk.f32.vlgmr.msrb.gmra.mxu1 %vm264_vm0, %v260_v20  ;;  %519 = vmatmul.msk.f32.gmra.mxu3 %vm264_vm0, %v261_v17 }
  0xa7   : > { %517 = vmatmul.msk.f32.gmra.mxu2 %vm264_vm0, %v262_v19 }
  0xae   : > { %522 = vmatmul.msk.f32.gmra.mxu1 %vm264_vm0, %v261_v17  ;;  %520 = vmatmul.msk.f32.gmra.mxu3 %vm264_vm0, %v262_v19 }
  0xb6   : > { %523 = vmatmul.msk.f32.gmra.mxu1 %vm264_vm0, %v262_v19 }
 0x10c   : > { %v332_v30 = vpop.f32.mrf.mxu1 }
 0x10d   : > { %524 = vst.msk [vmem:[%s609_s30 + $0x90] sm:$0xff] %vm236_vm1, %v332_v30 }
 0x111   : > { %v335_v31 = vpop.f32.mrf.mxu2 }
 0x112   : > { %525 = vst.msk [vmem:[%s609_s30 + $0x98] sm:$0xff] %vm236_vm1, %v335_v31  ;;  %v338_v32 = vpop.f32.mrf.mxu3 }
 0x113   : > { %526 = vst.msk [vmem:[%s609_s30 + $0xa0] sm:$0x3] %vm239_vm2, %v338_v32 }
 0x119   : > { %v358_v33 = vpop.f32.mrf.mxu2 }
 0x11a   : > { %527 = vst.msk [vmem:[%s609_s30 + $0xa8] sm:$0xff] %vm236_vm1, %v358_v33 }
 0x121   : > { %v384_v34 = vpop.f32.mrf.mxu3  ;;  %v361_v35 = vpop.f32.mrf.mxu2 }
 0x122   : > { %530 = vst.msk [vmem:[%s609_s30 + $0xc0] sm:$0xff] %vm236_vm1, %v384_v34 }
 0x123   : > { %v410_v36 = vpop.f32.mrf.mxu1  ;;  %528 = vst.msk [vmem:[%s609_s30 + $0xb0] sm:$0xff] %vm236_vm1, %v361_v35 }
 0x124   : > { %533 = vst.msk [vmem:[%s609_s30 + $0xd8] sm:$0xff] %vm236_vm1, %v410_v36 }
 0x129   : > { %v387_v37 = vpop.f32.mrf.mxu3 }
 0x12a   : > { %531 = vst.msk [vmem:[%s609_s30 + $0xc8] sm:$0xff] %vm236_vm1, %v387_v37  ;;  %v364_v38 = vpop.f32.mrf.mxu2 }
 0x12b   : > { %v413_v39 = vpop.f32.mrf.mxu1  ;;  %529 = vst.msk [vmem:[%s609_s30 + $0xb8] sm:$0x3] %vm239_vm2, %v364_v38 }
 0x12c   : > { %534 = vst.msk [vmem:[%s609_s30 + $0xe0] sm:$0xff] %vm236_vm1, %v413_v39 }
 0x131   : > { %v390_v40 = vpop.f32.mrf.mxu3 }
 0x132   : > { %532 = vst.msk [vmem:[%s609_s30 + $0xd0] sm:$0x3] %vm239_vm2, %v390_v40 }
 0x133   : > { %v416_v41 = vpop.f32.mrf.mxu1 }
 0x134   : > { %535 = vst.msk [vmem:[%s609_s30 + $0xe8] sm:$0x3] %vm239_vm2, %v416_v41 }
 0x135 PF: > { %s14_s15 = sadd.s32 1, %s557_s15  }
 0x136   : > { %p11_p4 = scmp.ge.s32.totalorder %s14_s15, 4  }
 0x138   :  { %13 = sbr.rel (!%p11_p4) target bundleno = 1 (0x1), region = 70 }

</bundles_post_ra>
